<compile_context>
chip_gen: v5e
topology: v5e:2x2
jax: 0.10.0
libtpu: 0.0.40
codegen_flags: <defaults>
</compile_context>

<pallas_src>
import functools

import jax
import jax.numpy as jnp
from jax.experimental import pallas as pl
from jax.experimental.pallas import tpu as pltpu

_LANE = 128      # lane width (last dim of a vreg)
_SUBLANE = 8     # sublane width (second-to-last dim)


def _round_up(v, m):
    return ((v + m - 1) // m) * m


# --------------------------------------------------------------------------
# Kernel: one row-tile of nodes per (core, tile) grid step.
#   y        = MLP(h_tile)         (bf16 MXU operands, f32 accumulate, f32 ReLU)
#   S        = 0/1 CSR tile built in-kernel from segment (start, end) bounds
#   o_ref   += S @ y               (segment-sum of this tile on the MXU)
# The output block (one per core) is resident across the inner "arbitrary"
# axis (constant index_map in t) and acts as the f32 accumulator.
# --------------------------------------------------------------------------
def _global_encoder_kernel(starts_ref, ends_ref, h_ref,
                           w1, b1, w2, b2, w3, b3, o_ref,
                           *, row_tile, tiles_per_core):
    c = pl.program_id(0)
    t = pl.program_id(1)

    @pl.when(t == 0)
    def _():
        o_ref[...] = jnp.zeros_like(o_ref)

    f32 = jnp.float32
    bf16 = jnp.bfloat16

    # ---- per-node MLP (bf16 in, f32 accumulate) ----
    y = jnp.dot(h_ref[...], w1[...], preferred_element_type=f32) + b1[...]
    y = jnp.maximum(y, 0.0).astype(bf16)
    y = jnp.dot(y, w2[...], preferred_element_type=f32) + b2[...]
    y = jnp.maximum(y, 0.0).astype(bf16)
    y = jnp.dot(y, w3[...], preferred_element_type=f32) + b3[...]
    y = y.astype(bf16)                                   # [row_tile, D_pad]

    # ---- CSR segment-assignment tile, built in-kernel (no HBM S stream) ----
    # S[g, r] = 1 iff starts[g] <= global_row(r) < ends[g].
    g_pad = o_ref.shape[0]
    row0 = (c * tiles_per_core + t) * row_tile
    rows = row0 + jax.lax.broadcasted_iota(jnp.int32, (g_pad, row_tile), 1)
    s = jnp.logical_and(rows >= starts_ref[...],
                        rows < ends_ref[...]).astype(bf16)   # [G_pad, row_tile]

    # Padded node rows (rows >= N) and padded segment rows (start == end == 0)
    # are automatically zero in S, so they contribute nothing.
    o_ref[...] += jnp.dot(s, y, preferred_element_type=f32)  # [G_pad, D_pad]


# --------------------------------------------------------------------------
# One-time parameter prep (hoisted out of the hot path): cast weights to bf16,
# biases to f32, and lane-pad only the output layer to 128 lanes so the
# resident accumulator / final store is an unmasked full-width vst.
# --------------------------------------------------------------------------
def prepare_params(params):
    w1, b1, w2, b2, w3, b3 = params
    f32, bf16 = jnp.float32, jnp.bfloat16
    H2, D = w3.shape
    D_p = _round_up(D, _LANE)
    w3p = jnp.zeros((H2, D_p), f32).at[:, :D].set(w3.astype(f32)).astype(bf16)
    b3p = jnp.zeros((1, D_p), f32).at[:, :D].set(jnp.reshape(b3, (1, D)).astype(f32))
    return dict(
        w1=w1.astype(bf16), b1=jnp.reshape(b1, (1, -1)).astype(f32),
        w2=w2.astype(bf16), b2=jnp.reshape(b2, (1, -1)).astype(f32),
        w3=w3p, b3=b3p, out_dim=D,
    )


# --------------------------------------------------------------------------
# Wrapper: adaptive row tiling, per-core node split, in-kernel CSR segments.
# --------------------------------------------------------------------------
def global_encoder_forward(h_dag, prep, obs_ptr=None, *,
                           max_row_tile=1024, num_core_splits=2):
    f32, bf16 = jnp.float32, jnp.bfloat16
    N, Din = h_dag.shape

    w1, b1 = prep["w1"], prep["b1"]
    w2, b2 = prep["w2"], prep["b2"]
    w3, b3 = prep["w3"], prep["b3"]
    D = prep["out_dim"]
    H1, H2 = w1.shape[1], w2.shape[1]
    D_p = w3.shape[1]

    # Adaptive row tile: big tiles amortize per-step overhead; small graphs
    # don't get padded far beyond N.
    row_tile = min(max(_round_up(max(N, 1), _LANE), _LANE), max_row_tile)
    n_blocks = max(-(-N // row_tile), 1)
    C = num_core_splits if n_blocks >= 2 else 1      # per-core partial outputs
    T = -(-n_blocks // C)                            # tiles per core
    N_p = C * T * row_tile

    # CSR pointers. obs_ptr=None == one segment covering all nodes.
    if obs_ptr is None:
        ptr = jnp.array([0, N], jnp.int32)
        G = 1
    else:
        ptr = jnp.asarray(obs_ptr, jnp.int32)
        G = int(ptr.shape[0]) - 1
    G_p = _round_up(max(G, 1), _SUBLANE)

    # Per-segment [start, end) bounds; padded segments get start == end == 0.
    starts = jnp.zeros((G_p, 1), jnp.int32).at[:G, 0].set(ptr[:-1])
    ends = jnp.zeros((G_p, 1), jnp.int32).at[:G, 0].set(ptr[1:])

    # Node features: bf16, padded along rows only (feature dim kept native).
    h = h_dag.astype(bf16)
    if N_p != N:
        h = jnp.zeros((N_p, Din), bf16).at[:N].set(h)

    kernel = functools.partial(_global_encoder_kernel,
                               row_tile=row_tile, tiles_per_core=T)
    const = lambda shape: pl.BlockSpec(shape, lambda c, t: (0, 0))

    out = pl.pallas_call(
        kernel,
        out_shape=jax.ShapeDtypeStruct((C, G_p, D_p), f32),
        grid_spec=pltpu.PrefetchScalarGridSpec(
            num_scalar_prefetch=0,
            grid=(C, T),
            in_specs=[
                const((G_p, 1)),                                      # seg starts
                const((G_p, 1)),                                      # seg ends
                pl.BlockSpec((row_tile, Din), lambda c, t: (c * T + t, 0)),
                const((Din, H1)), const((1, H1)),                     # layer 1
                const((H1, H2)), const((1, H2)),                      # layer 2
                const((H2, D_p)), const((1, D_p)),                    # layer 3
            ],
            out_specs=pl.BlockSpec((None, G_p, D_p), lambda c, t: (c, 0, 0)),
        ),
        compiler_params=pltpu.CompilerParams(
            # t is the reduction axis (resident accumulator) -> "arbitrary";
            # c splits the node range into independent partials -> "parallel"
            # (sharded across TensorCores on v7x, plain serial loop elsewhere).
            dimension_semantics=("parallel", "arbitrary"),
        ),
    )(starts, ends, h, w1, b1, w2, b2, w3, b3)

    # Sum per-core partials (G_p x D_p f32 is ~4 KiB) and strip padding.
    return out.sum(axis=0)[:G, :D]


# --------------------------------------------------------------------------
# Pure-JAX f32 reference (mirrors the PyTorch forward semantics)
# --------------------------------------------------------------------------
def reference_forward(h_dag, params, obs_ptr=None):
    w1, b1, w2, b2, w3, b3 = params
    y = jax.nn.relu(h_dag @ w1 + b1)
    y = jax.nn.relu(y @ w2 + b2)
    y = y @ w3 + b3
    if obs_ptr is None:
        return y.sum(0, keepdims=True)
    ptr = jnp.asarray(obs_ptr, jnp.int32)
    G = int(ptr.shape[0]) - 1
    N = h_dag.shape[0]
    seg_id = jnp.sum(jnp.arange(N)[:, None] >= ptr[None, 1:], axis=1)
    return jax.ops.segment_sum(y, seg_id, num_segments=G)


# --------------------------------------------------------------------------
# Deterministic synthetic parameters (no checkpoint loading)
# --------------------------------------------------------------------------
def init_params(key, in_dim, embed_dim, hid_dims):
    assert len(hid_dims) == 2, "kernel MLP is hardcoded for 2 hidden layers"
    dims = [in_dim] + list(hid_dims) + [embed_dim]
    keys = jax.random.split(key, len(dims) - 1)
    ps = []
    for k, a, b in zip(keys, dims[:-1], dims[1:]):
        kw, kb = jax.random.split(k)
        ps.append(0.2 * jax.random.normal(kw, (a, b), jnp.float32))
        ps.append(0.1 * jax.random.normal(kb, (1, b), jnp.float32))
    return tuple(ps)


if __name__ == "__main__":
    key = jax.random.PRNGKey(0)
    embed_dim = 16
    hid_dims = (32, 16)

    kx, kp, kx2 = jax.random.split(key, 3)
    params = init_params(kp, embed_dim, embed_dim, hid_dims)
    prep = prepare_params(params)          # one-time weight cast / lane pad

    ATOL, RTOL = 5e-2, 5e-2                # bf16 MXU operands vs f32 reference

    # --- small batch: 3 observations, 50 nodes total (single tile, C=1) ----
    N = 50
    obs_ptr = jnp.array([0, 20, 35, 50], jnp.int32)
    h_dag = jax.random.normal(kx, (N, embed_dim), jnp.float32)

    out = jax.block_until_ready(global_encoder_forward(h_dag, prep, obs_ptr))
    ref = reference_forward(h_dag, params, obs_ptr)
    assert out.shape == (3, embed_dim)
    assert jnp.allclose(out, ref, atol=ATOL, rtol=RTOL), \
        float(jnp.max(jnp.abs(out - ref)))

    # --- obs_ptr=None path: global sum over all nodes -> [1, D] ------------
    out_g = jax.block_until_ready(global_encoder_forward(h_dag, prep, None))
    ref_g = reference_forward(h_dag, params, None)
    assert out_g.shape == (1, embed_dim)
    assert jnp.allclose(out_g, ref_g, atol=ATOL, rtol=RTOL)

    # --- 300 nodes, default (adaptive) tiling: single 384-row tile ---------
    N2 = 300
    obs_ptr2 = jnp.array([0, 37, 150, 151, 300], jnp.int32)
    h_dag2 = jax.random.normal(kx2, (N2, embed_dim), jnp.float32)
    out2 = jax.block_until_ready(global_encoder_forward(h_dag2, prep, obs_ptr2))
    ref2 = reference_forward(h_dag2, params, obs_ptr2)
    assert out2.shape == (4, embed_dim)
    assert jnp.allclose(out2, ref2, atol=ATOL, rtol=RTOL), \
        float(jnp.max(jnp.abs(out2 - ref2)))

    # --- same data, forced small tiles: exercises C=2 core split, multiple
    #     accumulation steps per core, and row padding/masking ---------------
    out3 = jax.block_until_ready(
        global_encoder_forward(h_dag2, prep, obs_ptr2, max_row_tile=128))
    assert out3.shape == (4, embed_dim)
    assert jnp.allclose(out3, ref2, atol=ATOL, rtol=RTOL), \
        float(jnp.max(jnp.abs(out3 - ref2)))

    print("KERNEL_OK")
</pallas_src>

<mosaic_0001>
module attributes {stable_mosaic.version = 11 : i64} {
  func.func @_global_encoder_kernel(%arg0: i32, %arg1: i32, %arg2: memref<8x1xi32, #tpu.memory_space<vmem>>, %arg3: memref<8x1xi32, #tpu.memory_space<vmem>>, %arg4: memref<128x16xbf16, #tpu.memory_space<vmem>>, %arg5: memref<16x32xbf16, #tpu.memory_space<vmem>>, %arg6: memref<1x32xf32, #tpu.memory_space<vmem>>, %arg7: memref<32x16xbf16, #tpu.memory_space<vmem>>, %arg8: memref<1x16xf32, #tpu.memory_space<vmem>>, %arg9: memref<16x128xbf16, #tpu.memory_space<vmem>>, %arg10: memref<1x128xf32, #tpu.memory_space<vmem>>, %arg11: memref<1x8x128xf32, #tpu.memory_space<vmem>>) attributes {dimension_semantics = [#tpu.dimension_semantics<parallel>, #tpu.dimension_semantics<arbitrary>], iteration_bounds = array<i64: 1, 1>, scalar_prefetch = 0 : i64, scratch_operands = 0 : i64, tpu.core_type = #tpu.core_type<tc>, window_params = [{pipeline_mode = #tpu.pipeline_mode<synchronous>, transform_indices = @transform_0, window_bounds = array<i64: 8, 1>}, {pipeline_mode = #tpu.pipeline_mode<synchronous>, transform_indices = @transform_1, window_bounds = array<i64: 8, 1>}, {transform_indices = @transform_2, window_bounds = array<i64: 128, 16>}, {pipeline_mode = #tpu.pipeline_mode<synchronous>, transform_indices = @transform_3, window_bounds = array<i64: 16, 32>}, {pipeline_mode = #tpu.pipeline_mode<synchronous>, transform_indices = @transform_4, window_bounds = array<i64: 1, 32>}, {pipeline_mode = #tpu.pipeline_mode<synchronous>, transform_indices = @transform_5, window_bounds = array<i64: 32, 16>}, {pipeline_mode = #tpu.pipeline_mode<synchronous>, transform_indices = @transform_6, window_bounds = array<i64: 1, 16>}, {pipeline_mode = #tpu.pipeline_mode<synchronous>, transform_indices = @transform_7, window_bounds = array<i64: 16, 128>}, {pipeline_mode = #tpu.pipeline_mode<synchronous>, transform_indices = @transform_8, window_bounds = array<i64: 1, 128>}, {transform_indices = @transform_9, window_bounds = array<i64: 1, 8, 128>}]} {
    %c0_i32 = arith.constant 0 : i32
    %0 = arith.cmpi eq, %arg1, %c0_i32 : i32
    %1 = arith.extui %0 : i1 to i32
    %c0_i32_0 = arith.constant 0 : i32
    %2 = arith.cmpi ne, %1, %c0_i32_0 : i32
    scf.if %2 {
      %cst_29 = arith.constant 0.000000e+00 : f32
      %49 = vector.broadcast %cst_29 : f32 to vector<8x128xf32>
      %c0_30 = arith.constant 0 : index
      %c0_31 = arith.constant 0 : index
      %c0_32 = arith.constant 0 : index
      %50 = vector.load %arg11[%c0_30, %c0_31, %c0_32] : memref<1x8x128xf32, #tpu.memory_space<vmem>>, vector<1x8x128xf32>
      %51 = vector.shape_cast %50 : vector<1x8x128xf32> to vector<8x128xf32>
      %52 = vector.shape_cast %49 : vector<8x128xf32> to vector<1x8x128xf32>
      tpu.vector_store %arg11[%c0_30, %c0_31, %c0_32], %52 {strides = array<i32>} : memref<1x8x128xf32, #tpu.memory_space<vmem>>, vector<1x8x128xf32>,
    } else {
    }
    %c0 = arith.constant 0 : index
    %c0_1 = arith.constant 0 : index
    %3 = vector.load %arg4[%c0, %c0_1] : memref<128x16xbf16, #tpu.memory_space<vmem>>, vector<128x16xbf16>
    %c0_2 = arith.constant 0 : index
    %c0_3 = arith.constant 0 : index
    %4 = vector.load %arg5[%c0_2, %c0_3] : memref<16x32xbf16, #tpu.memory_space<vmem>>, vector<16x32xbf16>
    %cst = arith.constant dense<0.000000e+00> : vector<128x32xf32>
    %5 = tpu.matmul %3, %4, %cst {dimension_numbers = #tpu.dot_dimension_numbers<[1], [0], [0], [1], [0, 0, 1, 1], [], []>} : vector<128x16xbf16>, vector<16x32xbf16>, vector<128x32xf32> -> vector<128x32xf32>
    %c0_4 = arith.constant 0 : index
    %c0_5 = arith.constant 0 : index
    %6 = vector.load %arg6[%c0_4, %c0_5] : memref<1x32xf32, #tpu.memory_space<vmem>>, vector<1x32xf32>
    %7 = vector.broadcast %6 : vector<1x32xf32> to vector<128x32xf32>
    %8 = arith.addf %5, %7 : vector<128x32xf32>
    %cst_6 = arith.constant 0.000000e+00 : f32
    %9 = vector.broadcast %cst_6 : f32 to vector<128x32xf32>
    %10 = arith.maximumf %8, %9 : vector<128x32xf32>
    %11 = arith.truncf %10 : vector<128x32xf32> to vector<128x32xbf16>
    %c0_7 = arith.constant 0 : index
    %c0_8 = arith.constant 0 : index
    %12 = vector.load %arg7[%c0_7, %c0_8] : memref<32x16xbf16, #tpu.memory_space<vmem>>, vector<32x16xbf16>
    %cst_9 = arith.constant dense<0.000000e+00> : vector<128x16xf32>
    %13 = tpu.matmul %11, %12, %cst_9 {dimension_numbers = #tpu.dot_dimension_numbers<[1], [0], [0], [1], [0, 0, 1, 1], [], []>} : vector<128x32xbf16>, vector<32x16xbf16>, vector<128x16xf32> -> vector<128x16xf32>
    %c0_10 = arith.constant 0 : index
    %c0_11 = arith.constant 0 : index
    %14 = vector.load %arg8[%c0_10, %c0_11] : memref<1x16xf32, #tpu.memory_space<vmem>>, vector<1x16xf32>
    %15 = vector.broadcast %14 : vector<1x16xf32> to vector<128x16xf32>
    %16 = arith.addf %13, %15 : vector<128x16xf32>
    %cst_12 = arith.constant 0.000000e+00 : f32
    %17 = vector.broadcast %cst_12 : f32 to vector<128x16xf32>
    %18 = arith.maximumf %16, %17 : vector<128x16xf32>
    %19 = arith.truncf %18 : vector<128x16xf32> to vector<128x16xbf16>
    %c0_13 = arith.constant 0 : index
    %c0_14 = arith.constant 0 : index
    %20 = vector.load %arg9[%c0_13, %c0_14] : memref<16x128xbf16, #tpu.memory_space<vmem>>, vector<16x128xbf16>
    %cst_15 = arith.constant dense<0.000000e+00> : vector<128x128xf32>
    %21 = tpu.matmul %19, %20, %cst_15 {dimension_numbers = #tpu.dot_dimension_numbers<[1], [0], [0], [1], [0, 0, 1, 1], [], []>} : vector<128x16xbf16>, vector<16x128xbf16>, vector<128x128xf32> -> vector<128x128xf32>
    %c0_16 = arith.constant 0 : index
    %c0_17 = arith.constant 0 : index
    %22 = vector.load %arg10[%c0_16, %c0_17] : memref<1x128xf32, #tpu.memory_space<vmem>>, vector<1x128xf32>
    %23 = vector.broadcast %22 : vector<1x128xf32> to vector<128x128xf32>
    %24 = arith.addf %21, %23 : vector<128x128xf32>
    %25 = arith.truncf %24 : vector<128x128xf32> to vector<128x128xbf16>
    %c1_i32 = arith.constant 1 : i32
    %26 = arith.muli %arg0, %c1_i32 : i32
    %27 = arith.addi %26, %arg1 : i32
    %c128_i32 = arith.constant 128 : i32
    %28 = arith.muli %27, %c128_i32 : i32
    %29 = tpu.iota {dimensions = array<i32: 1>} : vector<8x128xi32>
    %30 = vector.broadcast %28 : i32 to vector<8x128xi32>
    %31 = arith.addi %30, %29 : vector<8x128xi32>
    %c0_18 = arith.constant 0 : index
    %c0_19 = arith.constant 0 : index
    %32 = vector.load %arg2[%c0_18, %c0_19] : memref<8x1xi32, #tpu.memory_space<vmem>>, vector<8x1xi32>
    %33 = vector.broadcast %32 : vector<8x1xi32> to vector<8x128xi32>
    %34 = arith.cmpi sge, %31, %33 : vector<8x128xi32>
    %c0_20 = arith.constant 0 : index
    %c0_21 = arith.constant 0 : index
    %35 = vector.load %arg3[%c0_20, %c0_21] : memref<8x1xi32, #tpu.memory_space<vmem>>, vector<8x1xi32>
    %36 = vector.broadcast %35 : vector<8x1xi32> to vector<8x128xi32>
    %37 = arith.cmpi slt, %31, %36 : vector<8x128xi32>
    %38 = arith.andi %34, %37 : vector<8x128xi1>
    %39 = arith.extui %38 : vector<8x128xi1> to vector<8x128xi32>
    %40 = arith.sitofp %39 : vector<8x128xi32> to vector<8x128xf32>
    %41 = arith.truncf %40 : vector<8x128xf32> to vector<8x128xbf16>
    %c0_22 = arith.constant 0 : index
    %c0_23 = arith.constant 0 : index
    %c0_24 = arith.constant 0 : index
    %42 = vector.load %arg11[%c0_22, %c0_23, %c0_24] : memref<1x8x128xf32, #tpu.memory_space<vmem>>, vector<1x8x128xf32>
    %43 = vector.shape_cast %42 : vector<1x8x128xf32> to vector<8x128xf32>
    %cst_25 = arith.constant dense<0.000000e+00> : vector<8x128xf32>
    %44 = tpu.matmul %41, %25, %cst_25 {dimension_numbers = #tpu.dot_dimension_numbers<[1], [0], [0], [1], [0, 0, 1, 1], [], []>} : vector<8x128xbf16>, vector<128x128xbf16>, vector<8x128xf32> -> vector<8x128xf32>
    %45 = arith.addf %43, %44 : vector<8x128xf32>
    %c0_26 = arith.constant 0 : index
    %c0_27 = arith.constant 0 : index
    %c0_28 = arith.constant 0 : index
    %46 = vector.load %arg11[%c0_26, %c0_27, %c0_28] : memref<1x8x128xf32, #tpu.memory_space<vmem>>, vector<1x8x128xf32>
    %47 = vector.shape_cast %46 : vector<1x8x128xf32> to vector<8x128xf32>
    %48 = vector.shape_cast %45 : vector<8x128xf32> to vector<1x8x128xf32>
    tpu.vector_store %arg11[%c0_26, %c0_27, %c0_28], %48 {strides = array<i32>} : memref<1x8x128xf32, #tpu.memory_space<vmem>>, vector<1x8x128xf32>,
    return
  }
  func.func @transform_0(%arg0: i32, %arg1: i32) -> (i32, i32) {
    %c0_i32 = arith.constant 0 : i32
    %c0_i32_0 = arith.constant 0 : i32
    %c0_i32_1 = arith.constant 0 : i32
    return %c0_i32, %c0_i32_0 : i32, i32
  }
  func.func @transform_1(%arg0: i32, %arg1: i32) -> (i32, i32) {
    %c0_i32 = arith.constant 0 : i32
    %c0_i32_0 = arith.constant 0 : i32
    %c0_i32_1 = arith.constant 0 : i32
    return %c0_i32, %c0_i32_0 : i32, i32
  }
  func.func @transform_2(%arg0: i32, %arg1: i32) -> (i32, i32) {
    %c1_i32 = arith.constant 1 : i32
    %0 = arith.muli %arg0, %c1_i32 : i32
    %1 = arith.addi %0, %arg1 : i32
    %c0_i32 = arith.constant 0 : i32
    %c0_i32_0 = arith.constant 0 : i32
    return %1, %c0_i32 : i32, i32
  }
  func.func @transform_3(%arg0: i32, %arg1: i32) -> (i32, i32) {
    %c0_i32 = arith.constant 0 : i32
    %c0_i32_0 = arith.constant 0 : i32
    %c0_i32_1 = arith.constant 0 : i32
    return %c0_i32, %c0_i32_0 : i32, i32
  }
  func.func @transform_4(%arg0: i32, %arg1: i32) -> (i32, i32) {
    %c0_i32 = arith.constant 0 : i32
    %c0_i32_0 = arith.constant 0 : i32
    %c0_i32_1 = arith.constant 0 : i32
    return %c0_i32, %c0_i32_0 : i32, i32
  }
  func.func @transform_5(%arg0: i32, %arg1: i32) -> (i32, i32) {
    %c0_i32 = arith.constant 0 : i32
    %c0_i32_0 = arith.constant 0 : i32
    %c0_i32_1 = arith.constant 0 : i32
    return %c0_i32, %c0_i32_0 : i32, i32
  }
  func.func @transform_6(%arg0: i32, %arg1: i32) -> (i32, i32) {
    %c0_i32 = arith.constant 0 : i32
    %c0_i32_0 = arith.constant 0 : i32
    %c0_i32_1 = arith.constant 0 : i32
    return %c0_i32, %c0_i32_0 : i32, i32
  }
  func.func @transform_7(%arg0: i32, %arg1: i32) -> (i32, i32) {
    %c0_i32 = arith.constant 0 : i32
    %c0_i32_0 = arith.constant 0 : i32
    %c0_i32_1 = arith.constant 0 : i32
    return %c0_i32, %c0_i32_0 : i32, i32
  }
  func.func @transform_8(%arg0: i32, %arg1: i32) -> (i32, i32) {
    %c0_i32 = arith.constant 0 : i32
    %c0_i32_0 = arith.constant 0 : i32
    %c0_i32_1 = arith.constant 0 : i32
    return %c0_i32, %c0_i32_0 : i32, i32
  }
  func.func @transform_9(%arg0: i32, %arg1: i32) -> (i32, i32, i32) {
    %c0_i32 = arith.constant 0 : i32
    %c0_i32_0 = arith.constant 0 : i32
    %c0_i32_1 = arith.constant 0 : i32
    return %arg0, %c0_i32, %c0_i32_0 : i32, i32, i32
  }
}

</mosaic_0001>

<bundles_post_ra>
// kernel: tpu_custom_call.1
= control target key start
LH: loop header
LB: loop body
LE: loop exit
PB: predicated region body
PF: predicated region fallthrough
CT: control target
= control target key end

     0   :  { %vm129_vm0 = vcmask 130048   ;;  %s748_s0 = inlined_call_operand.vmem [shape: s32[8,1], index: 0, kind: input, shape index: {}]   ;;  %s749_s1 = inlined_call_operand.vmem [shape: s32[8,1], index: 1, kind: input, shape index: {}]   ;;  %s750_s2 = inlined_call_operand.vmem [shape: bf16[128,16], index: 2, kind: input, shape index: {}]   ;;  %s751_s3 = inlined_call_operand.vmem [shape: bf16[16,32], index: 3, kind: input, shape index: {}]   ;;  %s752_s4 = inlined_call_operand.vmem [shape: f32[1,32], index: 4, kind: input, shape index: {}]   ;;  %s753_s5 = inlined_call_operand.vmem [shape: bf16[32,16], index: 5, kind: input, shape index: {}]   ;;  %s754_s6 = inlined_call_operand.vmem [shape: f32[1,16], index: 6, kind: input, shape index: {}]   ;;  %s755_s7 = inlined_call_operand.vmem [shape: bf16[16,128], index: 7, kind: input, shape index: {}]   ;;  %s756_s8 = inlined_call_operand.vmem [shape: f32[1,128], index: 8, kind: input, shape index: {}]   ;;  %s757_s9 = inlined_call_operand.hbm [shape: f32[1,8,128], index: 9, kind: output, shape index: {}]  }
   0x1   :  { %v579_v0 = vld [vmem:[%s751_s3] sm:$0xff] }
   0x2   :  { %v571_v1 = vld [vmem:[%s750_s2] sm:$0xff]  ;;  %161 = vmatpush.bf16.msra.mxu0 %v579_v0 }
   0x3   :  { %14 = vsyncpa [#allocation3], 0  ;;  %v572_v2 = vld [vmem:[%s750_s2 + $0x8] sm:$0xff]  ;;  %v573_v3 = vld [vmem:[%s750_s2 + $0x10] sm:$0xff]  ;;  %vm247_vm1 = vcmask 261120   ;;  %s481_s3 = sshll.u32 %s757_s9, 4  ;;  %s482_s3 = int_to_ptr.hbm [resolvable:$true] %s481_s3 }
   0x4   :  { %v574_v4 = vld [vmem:[%s750_s2 + $0x18] sm:$0xff]  ;;  %v575_v5 = vld [vmem:[%s750_s2 + $0x20] sm:$0xff]  ;;  %v576_v6 = vld [vmem:[%s750_s2 + $0x28] sm:$0xff] }
   0x5   :  { %532 = vmatmul.msk.bf16.vlgmr.msra.gmra.mxu0 %vm129_vm0, %v571_v1  ;;  %v577_v7 = vld [vmem:[%s750_s2 + $0x30] sm:$0xff]  ;;  %v581_v8 = vld [vmem:[%s753_s5 + $0x8] sm:$0xff]  ;;  %v580_v9 = vld [vmem:[%s753_s5] sm:$0xff] }
   0x6   :  { %278 = vmatpush.bf16.msra.mxu1 %v581_v8  ;;  %v578_v10 = vld [vmem:[%s750_s2 + $0x38] sm:$0xff]  ;;  %v588_v12 = vld [vmem:[%s752_s4] ss:$0 sm:$0xff] }
   0x7   :  { %v582_v62 = vld [vmem:[%s755_s7] sm:$0xff] }
   0x8   :  { %388 = vmatpush.bf16.msra.mxu2 %v582_v62  ;;  %v444_v62 = vld [vmem:[%s748_s0] sm:$0xff]  ;;  %s619_s0 = smov [#allocation2]  }
   0xa   :  { %279 = vmatpush.bf16.msra.mxu1 %v580_v9 }
  0x15   :  { %533 = vmatmul.msk.bf16.gmra.mxu0 %vm129_vm0, %v572_v2 }
  0x25   :  { %534 = vmatmul.msk.bf16.gmra.mxu0 %vm129_vm0, %v573_v3 }
  0x35   :  { %535 = vmatmul.msk.bf16.gmra.mxu0 %vm129_vm0, %v574_v4 }
  0x45   :  { %536 = vmatmul.msk.bf16.gmra.mxu0 %vm129_vm0, %v575_v5 }
  0x55   :  { %537 = vmatmul.msk.bf16.gmra.mxu0 %vm129_vm0, %v576_v6  ;;  %v589_v6 = vld [vmem:[%s754_s6] ss:$0 sm:$0xff] }
  0x65   :  { %538 = vmatmul.msk.bf16.gmra.mxu0 %vm129_vm0, %v577_v7 }
  0x75   :  { %539 = vmatmul.msk.bf16.gmra.mxu0 %vm129_vm0, %v578_v10 }
  0x82   :  { %v163_v11 = vpop.f32.mrf.mxu0 }
  0x83   :  { %v164_v13 = vadd.f32 %v588_v12, %v163_v11 }
  0x85   :  { %v203_v16 = vmax.f32 %v164_v13, 0.0 }
  0x8a   :  { %v165_v14 = vpop.f32.mrf.mxu0 }
  0x8b   :  { %v166_v15 = vadd.f32 %v588_v12, %v165_v14 }
  0x8d   :  { %v204_v17 = vmax.f32 %v166_v15, 0.0 }
  0x8f   :  { %v219_v18 = vpack.c.bf16 %v204_v17, %v203_v16 }
  0x91   :  { %548 = vmatmul.msk.bf16.vlgmr.msra.gmra.mxu1 %vm247_vm1, %v219_v18 }
  0x92   :  { %v168_v19 = vpop.f32.mrf.mxu0 }
  0x93   :  { %v169_v20 = vadd.f32 %v588_v12, %v168_v19 }
  0x95   :  { %v205_v23 = vmax.f32 %v169_v20, 0.0 }
  0x9a   :  { %v170_v21 = vpop.f32.mrf.mxu0 }
  0x9b   :  { %v171_v22 = vadd.f32 %v588_v12, %v170_v21 }
  0x9d   :  { %v206_v24 = vmax.f32 %v171_v22, 0.0 }
  0x9f   :  { %v220_v25 = vpack.c.bf16 %v206_v24, %v205_v23 }
  0xa1   :  { %549 = vmatmul.msk.bf16.gmra.mxu1 %vm247_vm1, %v220_v25 }
  0xa2   :  { %v173_v26 = vpop.f32.mrf.mxu0 }
  0xa3   :  { %v174_v27 = vadd.f32 %v588_v12, %v173_v26 }
  0xa5   :  { %v207_v30 = vmax.f32 %v174_v27, 0.0 }
  0xaa   :  { %v175_v28 = vpop.f32.mrf.mxu0 }
  0xab   :  { %v176_v29 = vadd.f32 %v588_v12, %v175_v28 }
  0xad   :  { %v208_v31 = vmax.f32 %v176_v29, 0.0 }
  0xaf   :  { %v221_v32 = vpack.c.bf16 %v208_v31, %v207_v30 }
  0xb1   :  { %550 = vmatmul.msk.bf16.gmra.mxu1 %vm247_vm1, %v221_v32 }
  0xb2   :  { %v178_v33 = vpop.f32.mrf.mxu0 }
  0xb3   :  { %v179_v34 = vadd.f32 %v588_v12, %v178_v33 }
  0xb5   :  { %v209_v37 = vmax.f32 %v179_v34, 0.0 }
  0xba   :  { %v180_v35 = vpop.f32.mrf.mxu0 }
  0xbb   :  { %v181_v36 = vadd.f32 %v588_v12, %v180_v35 }
  0xbd   :  { %v210_v38 = vmax.f32 %v181_v36, 0.0 }
  0xbf   :  { %v222_v39 = vpack.c.bf16 %v210_v38, %v209_v37 }
  0xc1   :  { %551 = vmatmul.msk.bf16.gmra.mxu1 %vm247_vm1, %v222_v39 }
  0xc2   :  { %v183_v40 = vpop.f32.mrf.mxu0 }
  0xc3   :  { %v184_v41 = vadd.f32 %v588_v12, %v183_v40 }
  0xc5   :  { %v211_v44 = vmax.f32 %v184_v41, 0.0 }
  0xca   :  { %v185_v42 = vpop.f32.mrf.mxu0 }
  0xcb   :  { %v186_v43 = vadd.f32 %v588_v12, %v185_v42 }
  0xcd   :  { %v212_v45 = vmax.f32 %v186_v43, 0.0 }
  0xcf   :  { %v223_v46 = vpack.c.bf16 %v212_v45, %v211_v44 }
  0xd1   :  { %552 = vmatmul.msk.bf16.gmra.mxu1 %vm247_vm1, %v223_v46 }
  0xd2   :  { %v188_v47 = vpop.f32.mrf.mxu0 }
  0xd3   :  { %v189_v48 = vadd.f32 %v588_v12, %v188_v47 }
  0xd5   :  { %v213_v51 = vmax.f32 %v189_v48, 0.0 }
  0xda   :  { %v190_v49 = vpop.f32.mrf.mxu0 }
  0xdb   :  { %v191_v50 = vadd.f32 %v588_v12, %v190_v49 }
  0xdd   :  { %v214_v52 = vmax.f32 %v191_v50, 0.0 }
  0xdf   :  { %v224_v53 = vpack.c.bf16 %v214_v52, %v213_v51 }
  0xe1   :  { %553 = vmatmul.msk.bf16.gmra.mxu1 %vm247_vm1, %v224_v53 }
  0xe2   :  { %v193_v54 = vpop.f32.mrf.mxu0 }
  0xe3   :  { %v194_v55 = vadd.f32 %v588_v12, %v193_v54 }
  0xe5   :  { %v215_v58 = vmax.f32 %v194_v55, 0.0 }
  0xea   :  { %v195_v56 = vpop.f32.mrf.mxu0 }
  0xeb   :  { %v196_v57 = vadd.f32 %v588_v12, %v195_v56 }
  0xed   :  { %v216_v59 = vmax.f32 %v196_v57, 0.0 }
  0xef   :  { %v225_v60 = vpack.c.bf16 %v216_v59, %v215_v58 }
  0xf1   :  { %554 = vmatmul.msk.bf16.gmra.mxu1 %vm247_vm1, %v225_v60 }
  0xf2   :  { %v198_v61 = vpop.f32.mrf.mxu0 }
  0xf3   :  { %v199_v63 = vadd.f32 %v588_v12, %v198_v61 }
  0xf5   :  { %v217_v2 = vmax.f32 %v199_v63, 0.0  ;;  %v617_v63 = vmov 0  }
  0xf6   :  { %587 = vset.pattern.permute.xlu0 %v617_v63 }
  0xf7   :  { %446 = vperm.xlu0 %587, %v444_v62  }
  0xfa   :  { %v200_v0 = vpop.f32.mrf.mxu0 }
  0xfb   :  { %v201_v1 = vadd.f32 %v588_v12, %v200_v0  ;;  %v449_v0 = vld [vmem:[%s749_s1] sm:$0xff]  ;;  %s479_s1 = sshll.u32 %s619_s0, 4  ;;  %s480_s1 = int_to_ptr.vmem [resolvable:$true] %s479_s1 }
  0xfd   :  { %v218_v3 = vmax.f32 %v201_v1, 0.0 }
  0xff   :  { %v226_v4 = vpack.c.bf16 %v218_v3, %v217_v2  ;;  %451 = vperm.xlu0 %587, %v449_v0   ;;  %v590_v2 = vld [vmem:[%s756_s8] ss:$0 sm:$0xff] }
 0x101   :  { %555 = vmatmul.msk.bf16.gmra.mxu1 %vm247_vm1, %v226_v4 }
 0x10e   :  { %v281_v5 = vpop.f32.mrf.mxu1 }
 0x10f   :  { %v282_v7 = vadd.f32 %v589_v6, %v281_v5 }
 0x111   :  { %v321_v10 = vmax.f32 %v282_v7, 0.0 }
 0x116   :  { %v283_v8 = vpop.f32.mrf.mxu1 }
 0x117   :  { %v284_v9 = vadd.f32 %v589_v6, %v283_v8 }
 0x119   :  { %v322_v11 = vmax.f32 %v284_v9, 0.0 }
 0x11b   :  { %v337_v13 = vpack.c.bf16 %v322_v11, %v321_v10 }
 0x11d   :  { %560 = vmatmul.msk.bf16.vlgmr.msra.gmra.mxu2 %vm129_vm0, %v337_v13 }
 0x11e   :  { %v286_v14 = vpop.f32.mrf.mxu1 }
 0x11f   :  { %v287_v12 = vadd.f32 %v589_v6, %v286_v14 }
 0x121   :  { %v323_v17 = vmax.f32 %v287_v12, 0.0 }
 0x126   :  { %v288_v15 = vpop.f32.mrf.mxu1 }
 0x127   :  { %v289_v16 = vadd.f32 %v589_v6, %v288_v15 }
 0x129   :  { %v324_v18 = vmax.f32 %v289_v16, 0.0 }
 0x12b   :  { %v338_v19 = vpack.c.bf16 %v324_v18, %v323_v17 }
 0x12d   :  { %561 = vmatmul.msk.bf16.gmra.mxu2 %vm129_vm0, %v338_v19 }
 0x12e   :  { %v291_v20 = vpop.f32.mrf.mxu1 }
 0x12f   :  { %v292_v21 = vadd.f32 %v589_v6, %v291_v20 }
 0x131   :  { %v325_v24 = vmax.f32 %v292_v21, 0.0 }
 0x136   :  { %v293_v22 = vpop.f32.mrf.mxu1 }
 0x137   :  { %v294_v23 = vadd.f32 %v589_v6, %v293_v22 }
 0x139   :  { %v326_v25 = vmax.f32 %v294_v23, 0.0 }
 0x13b   :  { %v339_v26 = vpack.c.bf16 %v326_v25, %v325_v24 }
 0x13d   :  { %562 = vmatmul.msk.bf16.gmra.mxu2 %vm129_vm0, %v339_v26 }
 0x13e   :  { %v296_v27 = vpop.f32.mrf.mxu1 }
 0x13f   :  { %v297_v28 = vadd.f32 %v589_v6, %v296_v27 }
 0x141   :  { %v327_v31 = vmax.f32 %v297_v28, 0.0 }
 0x146   :  { %v298_v29 = vpop.f32.mrf.mxu1 }
 0x147   :  { %v299_v30 = vadd.f32 %v589_v6, %v298_v29 }
 0x149   :  { %v328_v32 = vmax.f32 %v299_v30, 0.0 }
 0x14b   :  { %v340_v33 = vpack.c.bf16 %v328_v32, %v327_v31 }
 0x14d   :  { %563 = vmatmul.msk.bf16.gmra.mxu2 %vm129_vm0, %v340_v33 }
 0x14e   :  { %v301_v34 = vpop.f32.mrf.mxu1 }
 0x14f   :  { %v302_v35 = vadd.f32 %v589_v6, %v301_v34 }
 0x151   :  { %v329_v38 = vmax.f32 %v302_v35, 0.0 }
 0x156   :  { %v303_v36 = vpop.f32.mrf.mxu1 }
 0x157   :  { %v304_v37 = vadd.f32 %v589_v6, %v303_v36 }
 0x159   :  { %v330_v39 = vmax.f32 %v304_v37, 0.0 }
 0x15b   :  { %v341_v40 = vpack.c.bf16 %v330_v39, %v329_v38 }
 0x15d   :  { %564 = vmatmul.msk.bf16.gmra.mxu2 %vm129_vm0, %v341_v40 }
 0x15e   :  { %v306_v41 = vpop.f32.mrf.mxu1 }
 0x15f   :  { %v307_v42 = vadd.f32 %v589_v6, %v306_v41 }
 0x161   :  { %v331_v45 = vmax.f32 %v307_v42, 0.0 }
 0x166   :  { %v308_v43 = vpop.f32.mrf.mxu1 }
 0x167   :  { %v309_v44 = vadd.f32 %v589_v6, %v308_v43  ;;  %v440_v43 = vlaneseq }
 0x169   :  { %v332_v46 = vmax.f32 %v309_v44, 0.0  ;;  %v447_v42 = vpop.permute.xlu0 %446  ;;  %v441_v44 = vand.u32 127, %v440_v43 }
 0x16b   :  { %v342_v47 = vpack.c.bf16 %v332_v46, %v331_v45  ;;  %vm448_vm2 = vcmp.ge.s32.totalorder %v441_v44, %v447_v42  ;;  %v618_v46 = vmov 1.0|1.0  }
 0x16d   :  { %565 = vmatmul.msk.bf16.gmra.mxu2 %vm129_vm0, %v342_v47 }
 0x16e   :  { %v311_v48 = vpop.f32.mrf.mxu1 }
 0x16f   :  { %v312_v49 = vadd.f32 %v589_v6, %v311_v48 }
 0x171   :  { %v333_v52 = vmax.f32 %v312_v49, 0.0  ;;  %v452_v45 = vpop.permute.xlu0 %451 }
 0x172   :  { %vm453_vm3 = vcmp.lt.s32.totalorder %v441_v44, %v452_v45 }
 0x173   :  { %vm454_vm4 = vmand %vm448_vm2, %vm453_vm3 }
 0x174   :  { %vm569_vm5 = vmpackc.low %vm454_vm4, %vm454_vm4 }
 0x176   :  { %v313_v50 = vpop.f32.mrf.mxu1 }
 0x177   :  { %v314_v51 = vadd.f32 %v589_v6, %v313_v50 }
 0x179   :  { %v334_v53 = vmax.f32 %v314_v51, 0.0 }
 0x17b   :  { %v343_v54 = vpack.c.bf16 %v334_v53, %v333_v52 }
 0x17d   :  { %566 = vmatmul.msk.bf16.gmra.mxu2 %vm129_vm0, %v343_v54 }
 0x17e   :  { %v316_v55 = vpop.f32.mrf.mxu1 }
 0x17f   :  { %v317_v56 = vadd.f32 %v589_v6, %v316_v55 }
 0x181   :  { %v335_v59 = vmax.f32 %v317_v56, 0.0 }
 0x186   :  { %v318_v57 = vpop.f32.mrf.mxu1 }
 0x187   :  { %v319_v58 = vadd.f32 %v589_v6, %v318_v57 }
 0x189   :  { %v336_v60 = vmax.f32 %v319_v58, 0.0 }
 0x18b   :  { %v344_v61 = vpack.c.bf16 %v336_v60, %v335_v59 }
 0x18d   :  { %567 = vmatmul.msk.bf16.gmra.mxu2 %vm129_vm0, %v344_v61 }
 0x1a0   :  { %v390_v1 = vpop.f32.mrf.mxu2 }
 0x1a1   :  { %v391_v4 = vadd.f32 %v590_v2, %v390_v1 }
 0x1a8   :  { %v392_v3 = vpop.f32.mrf.mxu2 }
 0x1a9   :  { %v393_v5 = vadd.f32 %v590_v2, %v392_v3 }
 0x1ab   :  { %v430_v6 = vpack.c.bf16 %v393_v5, %v391_v4 }
 0x1b0   :  { %v395_v7 = vpop.f32.mrf.mxu2 }
 0x1b1   :  { %v396_v9 = vadd.f32 %v590_v2, %v395_v7 }
 0x1b8   :  { %v397_v8 = vpop.f32.mrf.mxu2 }
 0x1b9   :  { %v398_v10 = vadd.f32 %v590_v2, %v397_v8 }
 0x1bb   :  { %v431_v11 = vpack.c.bf16 %v398_v10, %v396_v9 }
 0x1c0   :  { %v400_v13 = vpop.f32.mrf.mxu2 }
 0x1c1   :  { %v401_v12 = vadd.f32 %v590_v2, %v400_v13 }
 0x1c8   :  { %v402_v14 = vpop.f32.mrf.mxu2 }
 0x1c9   :  { %v403_v15 = vadd.f32 %v590_v2, %v402_v14 }
 0x1cb   :  { %v432_v16 = vpack.c.bf16 %v403_v15, %v401_v12 }
 0x1d0   :  { %v405_v17 = vpop.f32.mrf.mxu2 }
 0x1d1   :  { %v406_v19 = vadd.f32 %v590_v2, %v405_v17 }
 0x1d8   :  { %v407_v18 = vpop.f32.mrf.mxu2 }
 0x1d9   :  { %v408_v20 = vadd.f32 %v590_v2, %v407_v18 }
 0x1db   :  { %v433_v21 = vpack.c.bf16 %v408_v20, %v406_v19 }
 0x1e0   :  { %v410_v22 = vpop.f32.mrf.mxu2 }
 0x1e1   :  { %v411_v40 = vadd.f32 %v590_v2, %v410_v22 }
 0x1e8   :  { %v412_v23 = vpop.f32.mrf.mxu2 }
 0x1e9   :  { %v413_v38 = vadd.f32 %v590_v2, %v412_v23 }
 0x1eb   :  { %v434_v41 = vpack.c.bf16 %v413_v38, %v411_v40 }
 0x1f0   :  { %v415_v24 = vpop.f32.mrf.mxu2 }
 0x1f1   :  { %v416_v37 = vadd.f32 %v590_v2, %v415_v24 }
 0x1f8   :  { %v417_v25 = vpop.f32.mrf.mxu2 }
 0x1f9   :  { %v418_v35 = vadd.f32 %v590_v2, %v417_v25 }
 0x1fb   :  { %v435_v39 = vpack.c.bf16 %v418_v35, %v416_v37 }
 0x200   :  { %v420_v26 = vpop.f32.mrf.mxu2 }
 0x201   :  { %v421_v34 = vadd.f32 %v590_v2, %v420_v26 }
 0x208   :  { %v422_v27 = vpop.f32.mrf.mxu2 }
 0x209   :  { %v423_v32 = vadd.f32 %v590_v2, %v422_v27 }
 0x20b   :  { %v436_v36 = vpack.c.bf16 %v423_v32, %v421_v34 }
 0x210   :  { %v425_v28 = vpop.f32.mrf.mxu2 }
 0x211   :  { %v426_v30 = vadd.f32 %v590_v2, %v425_v28 }
 0x218   :  { %v427_v29 = vpop.f32.mrf.mxu2 }
 0x219   :  { %v428_v31 = vadd.f32 %v590_v2, %v427_v29 }
 0x21b   :  { %v437_v33 = vpack.c.bf16 %v428_v31, %v426_v30 }
 0x21d   :  { %459 = vmatpush.bf16.msra.mxu3 %v437_v33 }
 0x221   :  { %460 = vmatpush.bf16.msra.mxu3 %v436_v36 }
 0x225   :  { %461 = vmatpush.bf16.msra.mxu3 %v435_v39 }
 0x229   :  { %462 = vmatpush.bf16.msra.mxu3 %v434_v41 }
 0x22d   :  { %463 = vmatpush.bf16.msra.mxu3 %v433_v21 }
 0x231   :  { %464 = vmatpush.bf16.msra.mxu3 %v432_v16 }
 0x235   :  { %465 = vmatpush.bf16.msra.mxu3 %v431_v11 }
 0x239   :  { %466 = vmatpush.bf16.msra.mxu3 %v430_v6 }
 0x23c   :  { %570 = vmatmul.msk.bf16.vlgmr.msra.gmra.mxu3 %vm569_vm5, %v618_v46 }
 0x2bf   :  { %v468_v47 = vpop.f32.mrf.mxu3 }
 0x2c0   :  { %473 = vst [vmem:[#allocation2] sm:$0xff] %v468_v47 }
 0x2c1   :  { %484 = dma.vmem_to_hbm [thread:$0]  %s480_s1, 128, %s482_s3, [#allocation3]  }
 0x2c7   :  { %v470_v48 = vpop.f32.mrf.mxu3 }
 0x2c8   :  { %615 = dma.done.wait [#allocation3], 128  }
 0x2c9   :  { %616 = vsyncadd [#allocation3], 4294967168 }
 0x2ca   :  { %489 = vsyncpa [#allocation3], 1 }

</bundles_post_ra>
